<compile_context>
chip_gen: v5e
topology: v5e:2x2
jax: 0.10.0
libtpu: 0.0.40
codegen_flags: <defaults>
</compile_context>

<pallas_src>
import functools

import jax
import jax.numpy as jnp
from jax.experimental import pallas as pl
from jax.experimental.pallas import tpu as pltpu


def _copy_block_kernel(src_ref, out_ref):
    # One grid step = one (block_rows, width) slab moved through the
    # auto-generated double-buffered pipeline.  Pure vectorized copy.
    out_ref[...] = src_ref[...]


def _copy_leading_rows(src, n_rows, *, max_block_rows=1024,
                       tile_bytes_target=2 * 1024 * 1024):
    """Return src[:n_rows] via a tiled, pipelined Pallas copy."""
    total_rows, width = src.shape
    itemsize = jnp.dtype(src.dtype).itemsize
    # Sublane granularity is dtype dependent: 8 rows for f32, 16 for bf16, 32 for i8.
    sublane = max(8, 32 // itemsize)

    # Largest block that is sublane-aligned, fits the VMEM budget
    # (2 tiles x 2 buffers x ~2 MiB = ~8 MiB, under the 16 MiB v5e scoped
    # default and far under v6e/v7x), and is no bigger than the output needs.
    rows_by_vmem = max(
        sublane,
        (tile_bytes_target // max(1, width * itemsize)) // sublane * sublane,
    )
    rows_needed = ((n_rows + sublane - 1) // sublane) * sublane
    block_rows = min(max_block_rows, rows_by_vmem, rows_needed)

    grid = (pl.cdiv(n_rows, block_rows),)

    return pl.pallas_call(
        _copy_block_kernel,
        out_shape=jax.ShapeDtypeStruct((n_rows, width), src.dtype),
        grid=grid,
        in_specs=[pl.BlockSpec((block_rows, width), lambda i: (i, 0))],
        out_specs=pl.BlockSpec((block_rows, width), lambda i: (i, 0)),
        compiler_params=pltpu.CompilerParams(
            # Every output block is independent (no carried accumulator),
            # so let the grid shard across v7x's two TensorCores.
            dimension_semantics=("parallel",),
        ),
    )(src)


@functools.partial(jax.jit, static_argnames=("seq_len",))
def absolute_positional_embedding(table, seq_len):
    """table[arange(seq_len)] == table[:seq_len], computed as a Pallas copy."""
    max_seq_len, dim = table.shape
    lane = 128

    # Lane-dense fast path: for dim < 128, view the row-major table as a
    # (rows, 128) slab so every store is a full unmasked 128-lane store
    # instead of a masked partial vst.  Layout is identical (row-major),
    # so a free reshape on each side restores the (seq_len, dim) view.
    if (
        0 < dim < lane
        and lane % dim == 0
        and (max_seq_len * dim) % lane == 0
        and (seq_len * dim) % lane == 0
        and (seq_len * dim) // lane >= 8      # at least one full (8,128) tile
    ):
        src = table.reshape((max_seq_len * dim) // lane, lane)
        out = _copy_leading_rows(src, (seq_len * dim) // lane)
        return out.reshape(seq_len, dim)

    return _copy_leading_rows(table, seq_len)


class AbsolutePositionalEmbeddingPallas:
    """Mirror of the PyTorch module; params initialized deterministically."""

    def __init__(self, dim, max_seq_len, key):
        # nn.Embedding default init ~ N(0, 1)
        self.weight = jax.random.normal(key, (max_seq_len, dim), dtype=jnp.float32)

    def __call__(self, x):
        seq_len = x.shape[1]
        return absolute_positional_embedding(self.weight, seq_len)


if __name__ == "__main__":
    key = jax.random.PRNGKey(0)
    k_emb, k_x = jax.random.split(key)

    dim = 32
    max_seq_len = 64
    batch, seq = 2, 8

    module = AbsolutePositionalEmbeddingPallas(dim, max_seq_len, k_emb)
    x = jax.random.normal(k_x, (batch, seq, dim), dtype=jnp.float32)

    # Main path (small seq -> plain (block_rows, dim) tiling).
    out = module(x)
    out = jax.block_until_ready(out)
    ref = module.weight[:seq]
    assert out.shape == (seq, dim), out.shape
    assert out.dtype == jnp.float32, out.dtype
    assert jnp.allclose(out, ref), "mismatch vs reference slice (main path)"

    # Also exercise the lane-dense fast path (seq*dim is a multiple of 8*128).
    seq2 = 32
    out2 = absolute_positional_embedding(module.weight, seq2)
    out2 = jax.block_until_ready(out2)
    assert out2.shape == (seq2, dim), out2.shape
    assert jnp.allclose(out2, module.weight[:seq2]), "mismatch (lane-dense path)"

    print("KERNEL_OK")
</pallas_src>

<mosaic_0001>
module attributes {stable_mosaic.version = 11 : i64} {
  func.func @_copy_block_kernel(%arg0: i32, %arg1: memref<8x32xf32, #tpu.memory_space<vmem>>, %arg2: memref<8x32xf32, #tpu.memory_space<vmem>>) attributes {dimension_semantics = [#tpu.dimension_semantics<parallel>], iteration_bounds = array<i64: 1>, scalar_prefetch = 0 : i64, scratch_operands = 0 : i64, tpu.core_type = #tpu.core_type<tc>, window_params = [{transform_indices = @transform_0, window_bounds = array<i64: 8, 32>}, {transform_indices = @transform_1, window_bounds = array<i64: 8, 32>}]} {
    %c0 = arith.constant 0 : index
    %c0_0 = arith.constant 0 : index
    %0 = vector.load %arg1[%c0, %c0_0] : memref<8x32xf32, #tpu.memory_space<vmem>>, vector<8x32xf32>
    %c0_1 = arith.constant 0 : index
    %c0_2 = arith.constant 0 : index
    %1 = vector.load %arg2[%c0_1, %c0_2] : memref<8x32xf32, #tpu.memory_space<vmem>>, vector<8x32xf32>
    tpu.vector_store %arg2[%c0_1, %c0_2], %0 {strides = array<i32>} : memref<8x32xf32, #tpu.memory_space<vmem>>, vector<8x32xf32>,
    return
  }
  func.func @transform_0(%arg0: i32) -> (i32, i32) {
    %c0_i32 = arith.constant 0 : i32
    %c0_i32_0 = arith.constant 0 : i32
    return %arg0, %c0_i32 : i32, i32
  }
  func.func @transform_1(%arg0: i32) -> (i32, i32) {
    %c0_i32 = arith.constant 0 : i32
    %c0_i32_0 = arith.constant 0 : i32
    return %arg0, %c0_i32 : i32, i32
  }
}

</mosaic_0001>

<bundles_post_ra>
// kernel: absolute_positional_embedding.1
= control target key start
LH: loop header
LB: loop body
LE: loop exit
PB: predicated region body
PF: predicated region fallthrough
CT: control target
= control target key end

     0   :  { %vm10_vm0 = vcmask 261120   ;;  %s72_s0 = inlined_call_operand.vmem [shape: f32[64,32], index: 0, kind: input, shape index: {}]   ;;  %s73_s1 = inlined_call_operand.hbm [shape: f32[8,32], index: 1, kind: output, shape index: {}]  }
   0x1   :  { %v9_v0 = vld [vmem:[%s72_s0] sm:$0xff] }
   0x2   :  { %6 = vsyncpa [#allocation3], 0  ;;  %s19_s10 = sshll.u32 %s73_s1, 4  ;;  %11 = vst.msk [vmem:[#allocation2] sm:$0xff] %vm10_vm0, %v9_v0  ;;  %s55_s11 = smov [#allocation2]   ;;  %s20_s10 = int_to_ptr.hbm [resolvable:$true] %s19_s10 }
   0x3   :  { %s17_s12 = sshll.u32 %s55_s11, 4  ;;  %s18_s12 = int_to_ptr.vmem [resolvable:$true] %s17_s12 }
   0x4   :  { %22 = dma.vmem_to_hbm [thread:$0]  %s18_s12, 128, %s20_s10, [#allocation3]  }
   0x5   :  { %53 = dma.done.wait [#allocation3], 128  }
   0x6   :  { %54 = vsyncadd [#allocation3], 4294967168 }
   0x7   :  { %27 = vsyncpa [#allocation3], 1 }

</bundles_post_ra>
